<compile_context>
chip_gen: v6e
topology: v6e:2x2x1
jax: 0.10.0
libtpu: 0.0.40
codegen_flags: <defaults>
</compile_context>

<pallas_src>
import functools

import numpy as np
import jax
import jax.numpy as jnp
from jax.experimental import pallas as pl
from jax.experimental.pallas import tpu as pltpu

VMEM_LIMIT = 32 * 1024 * 1024   # explicit, safe on v5e/v6e/v7x; tiles here are tiny
BN_EPS = 1e-5


# ----------------------------- Pallas kernels ------------------------------ #

def _conv1x1_kernel(x_ref, w_ref, b_ref, o_ref):
    # x: [C1, S] bf16, w: [C2, C1] bf16, b: [C2, 1] f32  ->  o: [C2, S] bf16
    z = jnp.dot(w_ref[...], x_ref[...], preferred_element_type=jnp.float32) + b_ref[...]
    o_ref[...] = z.astype(o_ref.dtype)


def _upsample_kernel(z_ref, rh_ref, rwt_ref, o_ref):
    # separable bilinear (align_corners=True):  o = Rh @ z @ Rw^T   (per image, per channel)
    z = z_ref[...].astype(jnp.float32)                                   # [H1, W1]
    t = jnp.dot(z, rwt_ref[...], preferred_element_type=jnp.float32)     # [H1, W2]
    o = jnp.dot(rh_ref[...], t, preferred_element_type=jnp.float32)      # [H2, W2]
    o_ref[...] = o.astype(o_ref.dtype)


def _conv3x3_stats_kernel(xp_ref, w_ref, b_ref, m_ref, y_ref, st_ref, *, wstride):
    # xp: [Cin, Lp]      zero-padded, flattened image (row stride = wstride), bf16
    # w : [Cout, 9*Cin]  taps flattened tap-major (index = t*Cin + c), bf16
    # b : [Cout, 1] f32, m: [1, Lv] validity mask f32
    # y : [Cout, Lv]     conv + bias output (bf16)
    # st: [Cout, 2]      running (sum, sumsq), accumulated across the whole batch grid
    n = pl.program_id(0)

    @pl.when(n == 0)
    def _init():
        st_ref[...] = jnp.zeros_like(st_ref)

    cout, lv = y_ref.shape
    xp = xp_ref[...]
    # 3x3 taps as lane-shifted slices of the padded row-flat image (no HBM im2col),
    # stacked into one [9*Cin, Lv] operand -> a single MXU matmul per grid step.
    taps = []
    for t in range(9):
        off = (t // 3) * wstride + (t % 3)
        taps.append(xp[:, off:off + lv])
    xs = jnp.concatenate(taps, axis=0)                               # [9*Cin, Lv]
    y = jnp.dot(w_ref[...], xs, preferred_element_type=jnp.float32) + b_ref[...]
    y_ref[...] = y.astype(y_ref.dtype)

    ym = y * m_ref[...]                 # mask out the wrap-around garbage columns
    s = jnp.sum(ym, axis=1, keepdims=True)
    ss = jnp.sum(ym * ym, axis=1, keepdims=True)
    st_ref[...] = st_ref[...] + jnp.concatenate([s, ss], axis=1)


def _bn_prelu_kernel(y_ref, st_ref, m_ref, g_ref, bt_ref, a_ref, o_ref, *, count):
    # train-mode BatchNorm (biased variance) from pre-accumulated stats + affine + PReLU.
    # Output garbage columns are zeroed (mask) so the result can be flat-padded directly
    # into the next conv's padded row-flat layout.
    y = y_ref[...].astype(jnp.float32)          # [Cout, Lv]
    st = st_ref[...]
    inv = 1.0 / count
    mean = st[:, 0:1] * inv
    var = jnp.maximum(st[:, 1:2] * inv - mean * mean, 0.0)
    z = (y - mean) * jax.lax.rsqrt(var + BN_EPS) * g_ref[...] + bt_ref[...]
    z = jnp.where(z > 0.0, z, z * a_ref[...])
    o_ref[...] = (z * m_ref[...]).astype(o_ref.dtype)


# --------------------------- pallas_call wrappers --------------------------- #

def conv1x1(x, w, b):
    n, c1, s = x.shape
    c2 = w.shape[0]
    return pl.pallas_call(
        _conv1x1_kernel,
        out_shape=jax.ShapeDtypeStruct((n, c2, s), jnp.bfloat16),
        grid=(n,),
        in_specs=[pl.BlockSpec((None, c1, s), lambda i: (i, 0, 0)),
                  pl.BlockSpec((c2, c1), lambda i: (0, 0)),
                  pl.BlockSpec((c2, 1), lambda i: (0, 0))],
        out_specs=pl.BlockSpec((None, c2, s), lambda i: (i, 0, 0)),
        compiler_params=pltpu.CompilerParams(
            dimension_semantics=("parallel",), vmem_limit_bytes=VMEM_LIMIT),
    )(x, w, b)


def upsample_bilinear(z, rh, rwt):
    n, c, h1, w1 = z.shape
    h2, w2 = rh.shape[0], rwt.shape[1]
    return pl.pallas_call(
        _upsample_kernel,
        out_shape=jax.ShapeDtypeStruct((n, c, h2, w2), jnp.bfloat16),
        grid=(n, c),
        in_specs=[pl.BlockSpec((None, None, h1, w1), lambda i, j: (i, j, 0, 0)),
                  pl.BlockSpec((h2, h1), lambda i, j: (0, 0)),
                  pl.BlockSpec((w1, w2), lambda i, j: (0, 0))],
        out_specs=pl.BlockSpec((None, None, h2, w2), lambda i, j: (i, j, 0, 0)),
        compiler_params=pltpu.CompilerParams(
            dimension_semantics=("parallel", "parallel"), vmem_limit_bytes=VMEM_LIMIT),
    )(z, rh, rwt)


def conv3x3_stats(xp, w, b, mask, *, wstride):
    n, cin, lp = xp.shape
    cout = w.shape[0]
    lv = mask.shape[-1]
    kernel = functools.partial(_conv3x3_stats_kernel, wstride=wstride)
    return pl.pallas_call(
        kernel,
        out_shape=(jax.ShapeDtypeStruct((n, cout, lv), jnp.bfloat16),
                   jax.ShapeDtypeStruct((cout, 2), jnp.float32)),
        grid=(n,),
        in_specs=[pl.BlockSpec((None, cin, lp), lambda i: (i, 0, 0)),
                  pl.BlockSpec((cout, 9 * cin), lambda i: (0, 0)),
                  pl.BlockSpec((cout, 1), lambda i: (0, 0)),
                  pl.BlockSpec((1, lv), lambda i: (0, 0))],
        out_specs=(pl.BlockSpec((None, cout, lv), lambda i: (i, 0, 0)),
                   pl.BlockSpec((cout, 2), lambda i: (0, 0))),     # resident accumulator
        compiler_params=pltpu.CompilerParams(
            dimension_semantics=("arbitrary",), vmem_limit_bytes=VMEM_LIMIT),
    )(xp, w, b, mask)


def bn_prelu(y, stats, mask, gamma, beta, alpha, count, out_dtype):
    n, cout, lv = y.shape
    kernel = functools.partial(_bn_prelu_kernel, count=float(count))
    return pl.pallas_call(
        kernel,
        out_shape=jax.ShapeDtypeStruct((n, cout, lv), out_dtype),
        grid=(n,),
        in_specs=[pl.BlockSpec((None, cout, lv), lambda i: (i, 0, 0)),
                  pl.BlockSpec((cout, 2), lambda i: (0, 0)),
                  pl.BlockSpec((1, lv), lambda i: (0, 0)),
                  pl.BlockSpec((cout, 1), lambda i: (0, 0)),
                  pl.BlockSpec((cout, 1), lambda i: (0, 0)),
                  pl.BlockSpec((1, 1), lambda i: (0, 0))],
        out_specs=pl.BlockSpec((None, cout, lv), lambda i: (i, 0, 0)),
        compiler_params=pltpu.CompilerParams(
            dimension_semantics=("parallel",), vmem_limit_bytes=VMEM_LIMIT),
    )(y, stats, mask, gamma, beta, alpha)


# ------------------------------- JAX glue ---------------------------------- #

def _interp_matrix(n_in, n_out):
    # bilinear, align_corners=True (matches nn.Upsample(mode='bilinear', align_corners=True))
    if n_in == 1:
        return jnp.ones((n_out, 1), jnp.float32)
    m = np.zeros((n_out, n_in), np.float32)
    pos = np.arange(n_out, dtype=np.float64) * (n_in - 1) / (n_out - 1)
    lo = np.clip(np.floor(pos).astype(np.int64), 0, n_in - 2)
    frac = (pos - lo).astype(np.float32)
    m[np.arange(n_out), lo] += (1.0 - frac)
    m[np.arange(n_out), lo + 1] += frac
    return jnp.asarray(m)


def _pad_flatten(x):
    # [N, C, H, W] -> [N, C, (H+2)*(W+2)+2]  (zero pad=1, flatten, +2 tail zeros so the
    # last tap slice off = 2*(W+2)+2 of length H*(W+2) stays in bounds)
    n, c, h, w = x.shape
    xp = jnp.pad(x, ((0, 0), (0, 0), (1, 1), (1, 1)))
    flat = xp.reshape(n, c, (h + 2) * (w + 2))
    return jnp.pad(flat, ((0, 0), (0, 0), (0, 2)))


def _pad_rowflat(a, w):
    # Stage-1 activation [N, C, H*(W+2)] with garbage columns already zeroed has row stride
    # (W+2) == the padded row stride, so the stage-2 padded row-flat input is a single pad:
    # front W+3 zeros (top pad row + left pad of row 0), back W+3 zeros (bottom pad + tail).
    return jnp.pad(a, ((0, 0), (0, 0), (w + 3, w + 3)))


def _valid_mask(h, w):
    # flattened conv output has row stride (w+2); the last 2 columns per row are garbage
    col = jnp.arange(h * (w + 2)) % (w + 2)
    return (col < w).astype(jnp.float32)[None, :]        # [1, h*(w+2)]


def _extract_valid(y_flat, h, w):
    n, c, _ = y_flat.shape
    return y_flat.reshape(n, c, h, w + 2)[:, :, :, :w]


def init_params(key, in_channels1, in_channels2, out_channels):
    c1, c2, co = in_channels1, in_channels2, out_channels
    cin1 = 2 * c2
    ks = jax.random.split(key, 14)

    def w(k, shape, fan_in):
        return jax.random.normal(k, shape, jnp.float32) / np.sqrt(float(fan_in))

    p = {}
    p["w_1x1"] = w(ks[0], (c2, c1), c1).astype(jnp.bfloat16)     # nn.Conv2d(c1, c2, 1)
    p["b_1x1"] = w(ks[1], (c2, 1), c1)
    # 3x3 conv weights stored tap-major flattened: w2d[o, t*Cin + c]
    p["w_c1"] = w(ks[2], (co, 9 * cin1), 9 * cin1).astype(jnp.bfloat16)   # conv2d_1 3x3
    p["b_c1"] = w(ks[3], (co, 1), 9 * cin1)
    p["w_c2"] = w(ks[4], (co, 9 * co), 9 * co).astype(jnp.bfloat16)       # conv2d_2 3x3
    p["b_c2"] = w(ks[5], (co, 1), 9 * co)
    p["bn"] = {}
    for d in (0, 1):   # domain-specific BN affine params
        g1 = 1.0 + 0.1 * jax.random.normal(ks[6 + d], (co, 1), jnp.float32)
        b1 = 0.10 * jax.random.normal(ks[8 + d], (co, 1), jnp.float32)
        g2 = 1.0 + 0.1 * jax.random.normal(ks[10 + d], (co, 1), jnp.float32)
        b2 = 0.05 * jax.random.normal(ks[12 + d], (co, 1), jnp.float32)
        p["bn"][d] = ((g1, b1), (g2, b2))
    p["alpha1"] = jnp.full((1, 1), 0.25, jnp.float32)            # PReLU default init
    p["alpha2"] = jnp.full((1, 1), 0.25, jnp.float32)
    return p


def up_block_forward(x1, x2, params, domain_label=0):
    """x1: low-res feature map NCHW (or NCDHW); x2: high-res skip feature map."""
    x1_shape = x1.shape
    five_d = (x1.ndim == 5)
    if five_d:   # 2.5D path: fold depth into batch, as the original module does
        n0, c0, d0, h0, w0 = x1.shape
        x1 = jnp.transpose(x1, (0, 2, 1, 3, 4)).reshape(n0 * d0, c0, h0, w0)
        nb, cb, db, hb, wb = x2.shape
        x2 = jnp.transpose(x2, (0, 2, 1, 3, 4)).reshape(nb * db, cb, hb, wb)

    n, c1, h1, w1 = x1.shape
    _, c2, h2, w2 = x2.shape

    x1b = x1.astype(jnp.bfloat16)
    x2b = x2.astype(jnp.bfloat16)

    # 1x1 conv (channels-first, lane dim = flattened spatial)
    z = conv1x1(x1b.reshape(n, c1, h1 * w1), params["w_1x1"], params["b_1x1"])
    z = z.reshape(n, c2, h1, w1)

    # separable bilinear upsample (align_corners=True): Rh @ z @ Rw^T per (image, channel)
    rh = _interp_matrix(h1, h2)               # [h2, h1]
    rwt = _interp_matrix(w1, w2).T            # [w1, w2]
    up = upsample_bilinear(z, rh, rwt)        # [n, c2, h2, w2] bf16

    # torch.cat([x2, x1], dim=1)
    xcat = jnp.concatenate([x2b, up], axis=1)                    # [n, 2*c2, h2, w2]

    (g1, b1), (g2, b2) = params["bn"][0 if domain_label == 0 else 1]
    co = params["w_c1"].shape[0]
    mask = _valid_mask(h2, w2)
    count = n * h2 * w2                                          # BN over whole batch

    # ConvBlockND stage 1: conv3x3 + bias + batch-global stats, then BN + PReLU (masked)
    y1, st1 = conv3x3_stats(_pad_flatten(xcat), params["w_c1"], params["b_c1"],
                            mask, wstride=w2 + 2)
    act1 = bn_prelu(y1, st1, mask, g1, b1, params["alpha1"], count, jnp.bfloat16)
    # TODO(synk): dropout between the two convs is identity for UpBlock default dropout_p=0.0.

    # ConvBlockND stage 2 (input re-padded directly from the row-flat masked activation)
    y2, st2 = conv3x3_stats(_pad_rowflat(act1, w2), params["w_c2"], params["b_c2"],
                            mask, wstride=w2 + 2)
    out_flat = bn_prelu(y2, st2, mask, g2, b2, params["alpha2"], count, jnp.float32)
    out = _extract_valid(out_flat, h2, w2)                       # [n, co, h2, w2] f32

    if five_d:
        out = out.reshape(x1_shape[0], -1, co, h2, w2).transpose(0, 2, 1, 3, 4)
    return out


if __name__ == "__main__":
    key = jax.random.PRNGKey(0)
    k1, k2, kp = jax.random.split(key, 3)
    N, C1, C2, CO = 2, 8, 4, 4          # in_channels1=8, in_channels2=4, out_channels=4
    H1 = W1 = 8                         # low-res spatial
    H2 = W2 = 16                        # high-res spatial (2x)
    x1 = jax.random.normal(k1, (N, C1, H1, W1), jnp.float32)
    x2 = jax.random.normal(k2, (N, C2, H2, W2), jnp.float32)
    params = init_params(kp, C1, C2, CO)

    out = up_block_forward(x1, x2, params, domain_label=0)
    out = jax.block_until_ready(out)

    assert out.shape == (N, CO, H2, W2), out.shape
    assert bool(jnp.all(jnp.isfinite(out)))
    print("KERNEL_OK")
</pallas_src>

<mosaic_0001>
module attributes {stable_mosaic.version = 11 : i64} {
  func.func @_conv1x1_kernel(%arg0: i32, %arg1: memref<1x8x64xbf16, #tpu.memory_space<vmem>>, %arg2: memref<4x8xbf16, #tpu.memory_space<vmem>>, %arg3: memref<4x1xf32, #tpu.memory_space<vmem>>, %arg4: memref<1x4x64xbf16, #tpu.memory_space<vmem>>) attributes {dimension_semantics = [#tpu.dimension_semantics<parallel>], iteration_bounds = array<i64: 2>, scalar_prefetch = 0 : i64, scratch_operands = 0 : i64, tpu.core_type = #tpu.core_type<tc>, window_params = [{transform_indices = @transform_0, window_bounds = array<i64: 1, 8, 64>}, {pipeline_mode = #tpu.pipeline_mode<synchronous>, transform_indices = @transform_1, window_bounds = array<i64: 4, 8>}, {pipeline_mode = #tpu.pipeline_mode<synchronous>, transform_indices = @transform_2, window_bounds = array<i64: 4, 1>}, {transform_indices = @transform_3, window_bounds = array<i64: 1, 4, 64>}]} {
    %c0 = arith.constant 0 : index
    %c0_0 = arith.constant 0 : index
    %0 = vector.load %arg2[%c0, %c0_0] : memref<4x8xbf16, #tpu.memory_space<vmem>>, vector<4x8xbf16>
    %c0_1 = arith.constant 0 : index
    %c0_2 = arith.constant 0 : index
    %c0_3 = arith.constant 0 : index
    %1 = vector.load %arg1[%c0_1, %c0_2, %c0_3] : memref<1x8x64xbf16, #tpu.memory_space<vmem>>, vector<1x8x64xbf16>
    %2 = vector.shape_cast %1 : vector<1x8x64xbf16> to vector<8x64xbf16>
    %cst = arith.constant dense<0.000000e+00> : vector<4x64xf32>
    %3 = tpu.matmul %0, %2, %cst {dimension_numbers = #tpu.dot_dimension_numbers<[1], [0], [0], [1], [0, 0, 1, 1], [], []>} : vector<4x8xbf16>, vector<8x64xbf16>, vector<4x64xf32> -> vector<4x64xf32>
    %c0_4 = arith.constant 0 : index
    %c0_5 = arith.constant 0 : index
    %4 = vector.load %arg3[%c0_4, %c0_5] : memref<4x1xf32, #tpu.memory_space<vmem>>, vector<4x1xf32>
    %5 = vector.broadcast %4 : vector<4x1xf32> to vector<4x64xf32>
    %6 = arith.addf %3, %5 : vector<4x64xf32>
    %7 = arith.truncf %6 : vector<4x64xf32> to vector<4x64xbf16>
    %c0_6 = arith.constant 0 : index
    %c0_7 = arith.constant 0 : index
    %c0_8 = arith.constant 0 : index
    %8 = vector.load %arg4[%c0_6, %c0_7, %c0_8] : memref<1x4x64xbf16, #tpu.memory_space<vmem>>, vector<1x4x64xbf16>
    %9 = vector.shape_cast %8 : vector<1x4x64xbf16> to vector<4x64xbf16>
    %10 = vector.shape_cast %7 : vector<4x64xbf16> to vector<1x4x64xbf16>
    tpu.vector_store %arg4[%c0_6, %c0_7, %c0_8], %10 {strides = array<i32>} : memref<1x4x64xbf16, #tpu.memory_space<vmem>>, vector<1x4x64xbf16>,
    return
  }
  func.func @transform_0(%arg0: i32) -> (i32, i32, i32) {
    %c0_i32 = arith.constant 0 : i32
    %c0_i32_0 = arith.constant 0 : i32
    %c0_i32_1 = arith.constant 0 : i32
    return %arg0, %c0_i32, %c0_i32_0 : i32, i32, i32
  }
  func.func @transform_1(%arg0: i32) -> (i32, i32) {
    %c0_i32 = arith.constant 0 : i32
    %c0_i32_0 = arith.constant 0 : i32
    %c0_i32_1 = arith.constant 0 : i32
    return %c0_i32, %c0_i32_0 : i32, i32
  }
  func.func @transform_2(%arg0: i32) -> (i32, i32) {
    %c0_i32 = arith.constant 0 : i32
    %c0_i32_0 = arith.constant 0 : i32
    %c0_i32_1 = arith.constant 0 : i32
    return %c0_i32, %c0_i32_0 : i32, i32
  }
  func.func @transform_3(%arg0: i32) -> (i32, i32, i32) {
    %c0_i32 = arith.constant 0 : i32
    %c0_i32_0 = arith.constant 0 : i32
    %c0_i32_1 = arith.constant 0 : i32
    return %arg0, %c0_i32, %c0_i32_0 : i32, i32, i32
  }
}

</mosaic_0001>

<bundles_post_ra>
// kernel: tpu_custom_call.1
= control target key start
LH: loop header
LB: loop body
LE: loop exit
PB: predicated region body
PF: predicated region fallthrough
CT: control target
= control target key end

     0   :  { %8 = vsyncpa [#allocation3], 0  ;;  %s680_s0 = inlined_call_operand.hbm [shape: bf16[2,8,64], index: 0, kind: input, shape index: {}]   ;;  %s681_s1 = inlined_call_operand.vmem [shape: bf16[4,8], index: 1, kind: input, shape index: {}]   ;;  %s682_s2 = inlined_call_operand.vmem [shape: f32[4,1], index: 2, kind: input, shape index: {}]   ;;  %s683_s3 = inlined_call_operand.hbm [shape: bf16[2,4,64], index: 3, kind: output, shape index: {}]  }
   0x1   :  { %10 = vsyncpa [#allocation3 + $0x1], 0 }
   0x2   :  { %11 = vsyncpa [#allocation4], 0 }
   0x3   :  { %13 = vsyncpa [#allocation4 + $0x1], 0  ;;  %s520_s12 = smov 0   ;;  %s522_s13 = smov 0  }
   0x4   :  { %s524_s14 = smov 0   ;;  %s526_s15 = smov 0  }
   0x5 LB: > { %s541_s16 = sadd.s32 4294967295, %s493_s15   ;;  %s330_s17 = sadd.s32 4294967294, %s493_s15   ;;  %s493_s15 = sphi %s526_s15, %s700_s15   ;;  %s489_s14 = sphi %s524_s14, %s699_s14   ;;  %s485_s13 = sphi %s522_s13, %s698_s13   ;;  %s481_s12 = sphi %s520_s12, %s697_s12  }
   0x6   : > { %s545_s18 = sadd.s32 1, %s493_s15   ;;  %s26_s19 = sadd.s32 1, %s489_s14 }
   0x7   : > { %s23_s20 = ssub.s32 %s493_s15, %s545_s18  ;;  %p33_p0 = scmp.ne.s32.totalorder %s489_s14, %s485_s13 }
   0x8   : > { %p24_p1 = scmp.eq.s32.totalorder %s23_s20, 0  ;;  %p34_p2 = scmp.eq.s32.totalorder %s493_s15, 0 }
   0x9   : > { %p39_p3 = scmp.ne.s32.totalorder %s485_s13, %s481_s12  ;;  %p40_p4 = scmp.eq.s32.totalorder %s541_s16, 0 }
   0xa   : > { %s557_s21 = scalar_select %p24_p1, %s489_s14, %s26_s19  }
   0xb   : > { %p559_p5 = por %p34_p2, %p33_p0  ;;  %p563_p6 = por %p40_p4, %p39_p3 }
   0xc   : > { %p105_p7 = scmp.eq.s32.totalorder %s541_s16, 1  ;;  %p111_p8 = scmp.eq.s32.totalorder %s330_s17, 1 }
   0xd   : > { %s687_s23 = scalar_select %p563_p6, 1, 0 }
   0xe   : > { %p363_p10 = scmp.lt.s32.totalorder %s493_s15, 2  ;;  %p570_p11 = por %p105_p7, %p33_p0 }
   0xf   : > { %p574_p12 = por %p111_p8, %p39_p3  ;;  %s137_s26 = sand.u32 1, %s489_s14  }
  0x10   : > { %s688_s24 = scalar_select %p570_p11, 1, 0 }
  0x11   : > { %s689_s25 = scalar_select %p574_p12, 1, 0 }
  0x12   : > { %s334_s27 = sshll.u32 %s493_s15, 6  ;;  %s333_s28 = sshll.u32 %s137_s26, 2 }
  0x13   : > { %s583_s4 = scalar_lea.hbm %s680_s0, %s334_s27  ;;  %s141_s5 = scalar_lea.vmem [#allocation2], %s333_s28 }
  0x14   : > { %s148_s6 = sshll.u32 %s141_s5, 4  ;;  %p587_p13 = pnand %p363_p10, %p559_p5  ;;  %s591_s6 = int_to_ptr.vmem [resolvable:$true] %s148_s6 }
  0x15   : > { %s138_s8 = scalar_lea.sflag [#allocation3], %s137_s26  ;;  %s401_s9 = scalar_lea.hbm %s583_s4, 64 }
  0x16   : > { %p402_p2 = scmp.ne.s32.totalorder %s583_s4, %s401_s9  ;;  %p403_p3 = pneg %p587_p13 }
  0x17   : > { %s406_s17 = scalar_lea.hbm %s680_s0, 128  ;;  %p407_p5 = scmp.lt.s32.totalorder %s583_s4, %s680_s0 }
  0x18   : > { %p404_p4 = pnand %p403_p3, %p402_p2  ;;  %p408_p8 = scmp.lt.s32.totalorder %s406_s17, %s401_s9 }
  0x1a   : > { %p405_p7 = pneg %p404_p4  ;;  %p409_p10 = por %p408_p8, %p407_p5 }
  0x1c   : > { %p410_p9 = pnand %p409_p10, %p405_p7 }
  0x1e   : > { %413 = shalt.err (!%p410_p9)
}
  0x1f   : > { %s414_s22 = scalar_lea.vmem %s591_s6, 64  ;;  %s495_s26 = smov [#allocation2]  }
  0x20   : > { %p415_p0 = scmp.ne.s32.totalorder %s591_s6, %s414_s22  ;;  %s419_s27 = sshll.u32 %s495_s26, 4  ;;  %s420_s27 = int_to_ptr.vmem [resolvable:$false] %s419_s27 }
  0x21   : > { %s421_s28 = scalar_lea.vmem %s420_s27, 128  ;;  %p422_p4 = scmp.lt.s32.totalorder %s591_s6, %s420_s27 }
  0x22   : > { %p417_p1 = pnand %p415_p0, %p403_p3  ;;  %p423_p12 = scmp.lt.s32.totalorder %s421_s28, %s414_s22 }
  0x24   : > { %p418_p2 = pneg %p417_p1  ;;  %p424_p11 = por %p423_p12, %p422_p4 }
  0x26   : > { %p425_p6 = pnand %p424_p11, %p418_p2 }
  0x28   : > { %428 = shalt.err (!%p425_p6)
}
  0x29   : > { %358 = dma.hbm_to_vmem [thread:$0]  (!%p587_p13), %s583_s4, 64, %s591_s6, %s138_s8  }
  0x2a   : > { %p691_p9 = scmp.lt.s32.totalorder %s493_s15, 3  ;;  %p692_p7 = scmp.ge.s32.totalorder %s493_s15, 1 }
  0x2c   : > { %p154_p0 = pnand %p692_p7, %p691_p9 }
  0x2d   : > { %s618_s29 = sand.u32 (!%p154_p0), 1, %s485_s13   ;;  %p693_p6 = scmp.ne.s32.totalorder (!%p154_p0), %s687_s23, 0 }
  0x2e   : > { %157 = sbr.rel (%p154_p0) target bundleno = 269 (0x10d), region = 32  ;;  %s336_s30 = sshll.u32 (!%p154_p0), %s618_s29, 2 }
  0x2f   : > { %s160_s5 = scalar_lea.sflag (!%p154_p0), [#allocation3], %s618_s29  ;;  %s163_s9 = scalar_lea.vmem (!%p154_p0), [#allocation2], %s336_s30 }
  0x33   : > { %472 = dma.done.wait (%p693_p6), %s160_s5, 64  }
  0x34   : > { %474 = vsyncadd (%p693_p6), %s160_s5, 4294967232  ;;  %v496_v0 = vmov 0.0   ;;  %vm497_vm0 = vmmov 0   ;;  %v498_v1 = vmov 0   ;;  %vm199_vm1 = vcmask 1043456   ;;  %s337_s8 = sshll.u32 %s618_s29, 1 }
  0x35   : > { %345 = vmatprep.subr.bf16.mxu0 %v496_v0  ;;  %347 = vmatprep.mubr.msk.bf16.mxu0 %vm497_vm0, %v496_v0  ;;  %v188_v2 = vld [vmem:[%s163_s9] sm:$0xf]  ;;  %vm195_vm2 = vcmask 64512   ;;  %s340_s10 = sshll.u32 %s541_s16, 5  ;;  %s185_s11 = scalar_lea.vmem [#allocation5], %s337_s8  ;;  %vm244_vm3 = vcmask 517120  }
  0x36   : > { %400 = vset.pattern.permute.xlu0 %v498_v1  ;;  %v189_v3 = vld [vmem:[%s682_s2] sm:$0xf]  ;;  %v201_v4 = vsel %vm199_vm1, %v188_v2, 0  ;;  %s260_s17 = sshll.u32 %s185_s11, 4  ;;  %s637_s22 = scalar_lea.hbm %s683_s3, %s340_s10  ;;  %s639_s17 = int_to_ptr.vmem [resolvable:$true] %s260_s17 }
  0x37   : > { %192 = vperm.xlu0 %400, %v189_v3   ;;  %346 = vmatpush3.bf16.msra.mxu0 %v201_v4  ;;  %v187_v5 = vld [vmem:[%s681_s1] sm:$0x3]  ;;  %s247_s16 = scalar_lea.sflag [#allocation4], %s618_s29  ;;  %s429_s26 = scalar_lea.vmem %s639_s17, 32 }
  0x38   : > { %p430_p11 = scmp.ne.s32.totalorder %s639_s17, %s429_s26  ;;  %p694_p12 = scmp.ne.s32.totalorder %s688_s24, 0 }
  0x39   : > { %s499_s27 = smov [#allocation5]  }
  0x3a   : > { %348 = vmatmul.mubr.msk.bf16.vlgmr.msra.gmra.mxu0 %vm195_vm2, %v187_v5  ;;  %p431_p13 = pnand %p430_p11, %p694_p12  ;;  %s433_s28 = sshll.u32 %s499_s27, 4  ;;  %s434_s28 = int_to_ptr.vmem [resolvable:$false] %s433_s28 }
  0x3b   : > { %s435_s30 = scalar_lea.vmem %s434_s28, 64  ;;  %p436_p3 = scmp.lt.s32.totalorder %s639_s17, %s434_s28 }
  0x3c   : > { %p432_p1 = pneg %p431_p13  ;;  %p437_p5 = scmp.lt.s32.totalorder %s435_s30, %s429_s26 }
  0x3e   : > { %p438_p8 = por %p437_p5, %p436_p3 }
  0x40   : > { %p439_p10 = pnand %p438_p8, %p432_p1 }
  0xb2   : > { %v193_v6 = vpop.permute.xlu0 %192 }
  0xfa   : > { %v237_v7 = vpop.f32.mrf.mxu0 }
  0xfb   : > { %v238_v8 = vadd.f32 %v237_v7, %v193_v6 }
  0xfc   : > { %v349_v9 = vpop.f32.mrf.mxu0 }
  0xfd   : > { %v243_v10 = vpack.c.bf16 %v238_v8, %v238_v8 }
  0xfe   : > { %v240_v11 = vpop.f32.mrf.mxu0 }
  0xff   : > { %245 = vst.msk [vmem:[%s185_s11] sm:$0x3] %vm244_vm3, %v243_v10 }
 0x100   : > { %v350_v12 = vpop.f32.mrf.mxu0 }
 0x101   : > { %442 = shalt.err (!%p439_p10)
}
 0x102   : > { %s443_s5 = scalar_lea.hbm %s637_s22, 32  ;;  %s447_s4 = scalar_lea.hbm %s683_s3, 64 }
 0x103   : > { %p444_p2 = scmp.ne.s32.totalorder %s637_s22, %s443_s5  ;;  %p448_p7 = scmp.lt.s32.totalorder %s637_s22, %s683_s3 }
 0x104   : > { %p449_p0 = scmp.lt.s32.totalorder %s447_s4, %s443_s5 }
 0x105   : > { %p445_p4 = pnand %p444_p2, %p694_p12 }
 0x106   : > { %p450_p6 = por %p449_p0, %p448_p7 }
 0x107   : > { %p446_p9 = pneg %p445_p4 }
 0x109   : > { %p451_p11 = pnand %p450_p6, %p446_p9 }
 0x10b   : > { %454 = shalt.err (!%p451_p11)
}
 0x10c   : > { %353 = dma.vmem_to_hbm [thread:$0]  (%p694_p12), %s639_s17, 32, %s637_s22, %s247_s16  }
 0x10d PF: > { %s272_s23 = sand.u32 1, %s481_s12   ;;  %p695_p13 = scmp.ne.s32.totalorder %s689_s25, 0 }
 0x10e   : > { %p696_p1 = scmp.ge.s32.totalorder %s493_s15, 2  ;;  %s273_s8 = scalar_lea.sflag [#allocation4], %s272_s23 }
 0x110   : > { %p360_p3 = pnand %p696_p1, %p695_p13 }
 0x112   : > { %p361_p5 = pneg %p360_p3 }
 0x114   : > { %476 = dma.done.wait (%p361_p5), %s273_s8, 32  }
 0x115   : > { %478 = vsyncadd (%p361_p5), %s273_s8, 4294967264  ;;  %p16_p8 = scmp.ge.s32.totalorder %s545_s18, 4   ;;  %s697_s12 = smov %s485_s13 }
 0x116   : > { %s698_s13 = smov %s489_s14  ;;  %s699_s14 = smov %s557_s21 }
 0x117   : > { %s700_s15 = smov %s545_s18  ;;  %18 = sbr.rel (!%p16_p8) target bundleno = 5 (0x5), region = 77 }
 0x11c   :  { %278 = vsyncpa [#allocation3], 1 }
 0x11d   :  { %280 = vsyncpa [#allocation3 + $0x1], 1 }
 0x11e   :  { %281 = vsyncpa [#allocation4], 1 }
 0x11f   :  { %283 = vsyncpa [#allocation4 + $0x1], 1 }

</bundles_post_ra>
